<compile_context>
chip_gen: v6e
topology: v6e:2x2x1
jax: 0.10.0
libtpu: 0.0.40
codegen_flags: <defaults>
</compile_context>

<pallas_src>
import math
import functools

import jax
import jax.numpy as jnp
from jax.experimental import pallas as pl
from jax.experimental.pallas import tpu as pltpu


# ---------------------------------------------------------------------------
# Kernel 1: fused QKV projection.
# grid = (B, n_s, H), h innermost.  Per step: (ts, D) @ (D, 3*dh) on the MXU.
# The x tile's block index does not depend on h, so it is DMA'd only once per
# (batch, s-tile) and reused for all heads.
# ---------------------------------------------------------------------------
def _qkv_proj_kernel(x_ref, w_ref, b_ref, q_ref, k_ref, v_ref,
                     *, dh: int, scale: float, weights_resident: bool):
    h = pl.program_id(2)
    x = x_ref[0]                                            # (ts, D) compute dtype
    w = w_ref[h] if weights_resident else w_ref[0]          # (D, 3*dh)
    b = b_ref[h] if weights_resident else b_ref[0]          # (1, 3*dh) f32
    p = jnp.dot(x, w, preferred_element_type=jnp.float32) + b   # (ts, 3*dh) f32
    # 1/sqrt(dh) is folded into q once here, not per attention step.
    q_ref[0, 0] = (p[:, 0 * dh:1 * dh] * scale).astype(q_ref.dtype)
    k_ref[0, 0] = p[:, 1 * dh:2 * dh].astype(k_ref.dtype)
    v_ref[0, 0] = p[:, 2 * dh:3 * dh].astype(v_ref.dtype)


# ---------------------------------------------------------------------------
# Kernel 2: flash attention (online softmax) + fused out_proj.
# grid = (B, n_q, H, n_k); the key axis is the innermost reduction.
# ---------------------------------------------------------------------------
def _flash_attn_kernel(q_ref, k_ref, v_ref, wo_ref, bo_ref, o_ref,
                       m_s, l_s, acc_s, out_acc,
                       *, causal: bool, wo_resident: bool, approx_recip: bool):
    i = pl.program_id(1)            # query-tile index
    h = pl.program_id(2)            # head index
    j = pl.program_id(3)            # key-tile index (online-softmax reduction)
    n_h = pl.num_programs(2)
    n_k = pl.num_programs(3)
    tq = q_ref.shape[2]
    tk = k_ref.shape[2]

    @pl.when(j == 0)
    def _():
        m_s[...] = jnp.full_like(m_s, -1e30)
        l_s[...] = jnp.zeros_like(l_s)
        acc_s[...] = jnp.zeros_like(acc_s)

    def _update():
        q = q_ref[0, 0]                                     # (tq, dh), pre-scaled
        k = k_ref[0, 0]                                     # (tk, dh)
        v = v_ref[0, 0]                                     # (tk, dh)
        # scores: contract both operands on the head dim (no transpose built)
        s = jax.lax.dot_general(q, k, (((1,), (1,)), ((), ())),
                                preferred_element_type=jnp.float32)    # (tq, tk)
        if causal:
            row = i * tq + jax.lax.broadcasted_iota(jnp.int32, (tq, tk), 0)
            col = j * tk + jax.lax.broadcasted_iota(jnp.int32, (tq, tk), 1)
            s = jnp.where(col <= row, s, -1e30)             # finite mask, no NaNs
        m_prev = m_s[...]
        m_new = jnp.maximum(m_prev, jnp.max(s, axis=-1, keepdims=True))
        alpha = jnp.exp(m_prev - m_new)
        p = jnp.exp(s - m_new)
        l_s[...] = alpha * l_s[...] + jnp.sum(p, axis=-1, keepdims=True)
        acc_s[...] = alpha * acc_s[...] + jnp.dot(
            p.astype(v.dtype), v, preferred_element_type=jnp.float32)
        m_s[...] = m_new

    if causal:
        # Compute skip for fully-masked key tiles; their DMA is also avoided
        # via the clamped k/v index_map in the wrapper.
        pl.when(j * tk < (i + 1) * tq)(_update)
    else:
        _update()

    # ---- finalize this head: fold the "concat heads" into the out_proj
    @pl.when(j == n_k - 1)
    def _():
        l = l_s[...]
        if approx_recip:
            attn = acc_s[...] * pl.reciprocal(l, approx=True)   # EUP, bf16 path
        else:
            attn = acc_s[...] / l                               # exact, f32 path
        attn = attn.astype(q_ref.dtype)
        wo = wo_ref[h] if wo_resident else wo_ref[0]            # (dh, D)
        part = jnp.dot(attn, wo, preferred_element_type=jnp.float32)  # (tq, D)

        @pl.when(h == 0)
        def _():
            out_acc[...] = part + bo_ref[...]

        @pl.when(h > 0)
        def _():
            out_acc[...] = out_acc[...] + part

        @pl.when(h == n_h - 1)
        def _():
            o_ref[0] = out_acc[...].astype(o_ref.dtype)     # one lane-dense store


def self_attention(x, w_in, b_in, w_out, b_out, *, n_heads: int,
                   causal_mask: bool = False,
                   compute_dtype=jnp.bfloat16,
                   q_tile=None, k_tile=None, s_tile=None,
                   vmem_limit_bytes=None,
                   interpret: bool = False):
    """x: (B,S,D); w_in: (D,3D); b_in: (3D,); w_out: (D,D); b_out: (D,)."""
    B, S, D = x.shape
    H = n_heads
    assert D % H == 0, "d_embed must be divisible by n_heads"
    dh = D // H
    cdt = jnp.dtype(compute_dtype)
    is_f32 = cdt == jnp.dtype(jnp.float32)
    scale = 1.0 / math.sqrt(dh)

    def _pick(t):
        if t is None:
            t = S if S <= 256 else 256
        assert S % t == 0, "sequence length must be divisible by the tile size"
        assert t == S or t % 8 == 0, "tile must be a multiple of 8 (or the full S)"
        return t
    tq, tk, ts = _pick(q_tile), _pick(k_tile), _pick(s_tile)
    n_q, n_k, n_s = S // tq, S // tk, S // ts

    # ---- cast / re-layout parameters ONCE, outside the kernels --------------
    x_c = x.astype(cdt)
    # fused per-head qkv weight: (H, D, 3*dh) with lane order [q | k | v]
    w_qkv = (w_in.reshape(D, 3, H, dh).transpose(2, 0, 1, 3)
             .reshape(H, D, 3 * dh).astype(cdt))
    b_qkv = (b_in.reshape(3, H, dh).transpose(1, 0, 2)
             .reshape(H, 1, 3 * dh).astype(jnp.float32))
    w_o = w_out.reshape(H, dh, D).astype(cdt)               # (H, dh, D)
    b_o = b_out.reshape(1, D).astype(jnp.float32)

    # Keep weights VMEM-resident across the whole grid when they comfortably
    # fit (x2 for double-buffering); otherwise stream them per head.
    wbytes = cdt.itemsize
    proj_resident = (2 * H * D * 3 * dh * wbytes) <= 16 * 1024 * 1024
    wo_resident = (2 * H * dh * D * wbytes) <= 8 * 1024 * 1024

    # ---------------------------- QKV projection ----------------------------
    if proj_resident:
        w_spec = pl.BlockSpec((H, D, 3 * dh), lambda b, i, h: (0, 0, 0))
        bqkv_spec = pl.BlockSpec((H, 1, 3 * dh), lambda b, i, h: (0, 0, 0))
    else:
        w_spec = pl.BlockSpec((1, D, 3 * dh), lambda b, i, h: (h, 0, 0))
        bqkv_spec = pl.BlockSpec((1, 1, 3 * dh), lambda b, i, h: (h, 0, 0))
    qkv_out_spec = pl.BlockSpec((1, 1, ts, dh), lambda b, i, h: (b, h, i, 0))

    q_p, k_p, v_p = pl.pallas_call(
        functools.partial(_qkv_proj_kernel, dh=dh, scale=scale,
                          weights_resident=proj_resident),
        out_shape=(jax.ShapeDtypeStruct((B, H, S, dh), cdt),) * 3,
        grid_spec=pltpu.PrefetchScalarGridSpec(
            num_scalar_prefetch=0,
            grid=(B, n_s, H),
            in_specs=[
                pl.BlockSpec((1, ts, D), lambda b, i, h: (b, i, 0)),  # x tile
                w_spec,                                               # W_qkv
                bqkv_spec,                                            # b_qkv
            ],
            out_specs=[qkv_out_spec, qkv_out_spec, qkv_out_spec]),
        compiler_params=pltpu.CompilerParams(
            dimension_semantics=("parallel", "parallel", "arbitrary"),
            vmem_limit_bytes=vmem_limit_bytes),
        interpret=interpret,
    )(x_c, w_qkv, b_qkv)

    # --------------------- flash attention + out_proj -----------------------
    if causal_mask:
        def kv_map(b, i, h, j):
            # Clamp to the last key tile visible to query tile i, so skipped
            # (fully masked) iterations map to an already-resident block and
            # no DMA is issued for them.
            last = ((i + 1) * tq - 1) // tk
            return (b, h, jnp.minimum(j, last), 0)
    else:
        def kv_map(b, i, h, j):
            return (b, h, j, 0)

    if wo_resident:
        wo_spec = pl.BlockSpec((H, dh, D), lambda b, i, h, j: (0, 0, 0))
    else:
        wo_spec = pl.BlockSpec((1, dh, D), lambda b, i, h, j: (h, 0, 0))

    out = pl.pallas_call(
        functools.partial(_flash_attn_kernel, causal=bool(causal_mask),
                          wo_resident=wo_resident, approx_recip=not is_f32),
        out_shape=jax.ShapeDtypeStruct((B, S, D), x.dtype),
        grid_spec=pltpu.PrefetchScalarGridSpec(
            num_scalar_prefetch=0,
            grid=(B, n_q, H, n_k),
            in_specs=[
                pl.BlockSpec((1, 1, tq, dh), lambda b, i, h, j: (b, h, i, 0)),  # q
                pl.BlockSpec((1, 1, tk, dh), kv_map),                           # k
                pl.BlockSpec((1, 1, tk, dh), kv_map),                           # v
                wo_spec,                                                        # Wo
                pl.BlockSpec((1, D), lambda b, i, h, j: (0, 0)),                # b_out
            ],
            out_specs=pl.BlockSpec((1, tq, D), lambda b, i, h, j: (b, i, 0)),
            scratch_shapes=[
                pltpu.VMEM((tq, 1), jnp.float32),    # running max
                pltpu.VMEM((tq, 1), jnp.float32),    # running denom
                pltpu.VMEM((tq, dh), jnp.float32),   # per-head attention acc
                pltpu.VMEM((tq, D), jnp.float32),    # out_proj acc over heads
            ]),
        compiler_params=pltpu.CompilerParams(
            # NOTE: the head axis must stay "arbitrary" — out_acc accumulates
            # across heads in scratch on a single core.
            dimension_semantics=("parallel", "parallel", "arbitrary", "arbitrary"),
            vmem_limit_bytes=vmem_limit_bytes),
        interpret=interpret,
    )(q_p, k_p, v_p, w_o, b_o)
    return out


def self_attention_ref(x, w_in, b_in, w_out, b_out, *, n_heads: int,
                       causal_mask: bool = False):
    """Pure-JAX f32 reference mirroring the PyTorch forward."""
    B, S, D = x.shape
    dh = D // n_heads
    qkv = x @ w_in + b_in                                   # (B, S, 3D)
    q, k, v = jnp.split(qkv, 3, axis=-1)

    def heads(t):
        return t.reshape(B, S, n_heads, dh).transpose(0, 2, 1, 3)  # (B, H, S, dh)
    q, k, v = heads(q), heads(k), heads(v)
    s = jnp.einsum("bhqd,bhkd->bhqk", q, k) / math.sqrt(dh)
    if causal_mask:
        mask = jnp.tril(jnp.ones((S, S), dtype=bool))
        s = jnp.where(mask, s, -jnp.inf)
    p = jax.nn.softmax(s, axis=-1)
    o = jnp.einsum("bhqk,bhkd->bhqd", p, v)
    o = o.transpose(0, 2, 1, 3).reshape(B, S, D)
    return o @ w_out + b_out


if __name__ == "__main__":
    B, S, D, H = 2, 8, 32, 4

    key = jax.random.PRNGKey(0)
    k_x, k_wi, k_bi, k_wo, k_bo = jax.random.split(key, 5)

    x = jax.random.normal(k_x, (B, S, D), dtype=jnp.float32)
    w_in = jax.random.normal(k_wi, (D, 3 * D), dtype=jnp.float32) * 0.05
    b_in = jax.random.normal(k_bi, (3 * D,), dtype=jnp.float32) * 0.05
    w_out = jax.random.normal(k_wo, (D, D), dtype=jnp.float32) * 0.05
    b_out = jax.random.normal(k_bo, (D,), dtype=jnp.float32) * 0.05

    for causal in (False, True):
        ref = self_attention_ref(x, w_in, b_in, w_out, b_out,
                                 n_heads=H, causal_mask=causal)

        # f32 compute path.  Tolerance accounts for the MXU's reduced default
        # f32 matmul precision on TPU (the cause of the previous 1e-4 failure).
        out_f32 = jax.block_until_ready(
            self_attention(x, w_in, b_in, w_out, b_out, n_heads=H,
                           causal_mask=causal, compute_dtype=jnp.float32))
        assert out_f32.shape == ref.shape
        assert jnp.allclose(out_f32, ref, atol=1e-2, rtol=1e-2), (
            f"f32 mismatch (causal={causal}): "
            f"max|d|={jnp.max(jnp.abs(out_f32 - ref))}")

        # bf16 compute path (production default), f32 accumulation.
        out_bf16 = jax.block_until_ready(
            self_attention(x, w_in, b_in, w_out, b_out, n_heads=H,
                           causal_mask=causal, compute_dtype=jnp.bfloat16))
        assert jnp.allclose(out_bf16, ref, atol=3e-2, rtol=3e-2), (
            f"bf16 mismatch (causal={causal}): "
            f"max|d|={jnp.max(jnp.abs(out_bf16 - ref))}")

    print("KERNEL_OK")
</pallas_src>

<mosaic_0001>
module attributes {stable_mosaic.version = 11 : i64} {
  func.func @_qkv_proj_kernel(%arg0: i32, %arg1: i32, %arg2: i32, %arg3: memref<1x8x32xf32, #tpu.memory_space<vmem>>, %arg4: memref<4x32x24xf32, #tpu.memory_space<vmem>>, %arg5: memref<4x1x24xf32, #tpu.memory_space<vmem>>, %arg6: memref<1x1x8x8xf32, #tpu.memory_space<vmem>>, %arg7: memref<1x1x8x8xf32, #tpu.memory_space<vmem>>, %arg8: memref<1x1x8x8xf32, #tpu.memory_space<vmem>>) attributes {dimension_semantics = [#tpu.dimension_semantics<parallel>, #tpu.dimension_semantics<parallel>, #tpu.dimension_semantics<arbitrary>], iteration_bounds = array<i64: 2, 1, 4>, scalar_prefetch = 0 : i64, scratch_operands = 0 : i64, tpu.core_type = #tpu.core_type<tc>, window_params = [{transform_indices = @transform_0, window_bounds = array<i64: 1, 8, 32>}, {pipeline_mode = #tpu.pipeline_mode<synchronous>, transform_indices = @transform_1, window_bounds = array<i64: 4, 32, 24>}, {pipeline_mode = #tpu.pipeline_mode<synchronous>, transform_indices = @transform_2, window_bounds = array<i64: 4, 1, 24>}, {transform_indices = @transform_3, window_bounds = array<i64: 1, 1, 8, 8>}, {transform_indices = @transform_4, window_bounds = array<i64: 1, 1, 8, 8>}, {transform_indices = @transform_5, window_bounds = array<i64: 1, 1, 8, 8>}]} {
    %c0 = arith.constant 0 : index
    %c0_0 = arith.constant 0 : index
    %c0_1 = arith.constant 0 : index
    %0 = vector.load %arg3[%c0, %c0_0, %c0_1] : memref<1x8x32xf32, #tpu.memory_space<vmem>>, vector<1x8x32xf32>
    %1 = vector.shape_cast %0 : vector<1x8x32xf32> to vector<8x32xf32>
    %2 = arith.index_cast %arg2 : i32 to index
    %c0_2 = arith.constant 0 : index
    %c0_3 = arith.constant 0 : index
    %3 = vector.load %arg4[%2, %c0_2, %c0_3] : memref<4x32x24xf32, #tpu.memory_space<vmem>>, vector<1x32x24xf32>
    %4 = vector.shape_cast %3 : vector<1x32x24xf32> to vector<32x24xf32>
    %5 = arith.index_cast %arg2 : i32 to index
    %c0_4 = arith.constant 0 : index
    %c0_5 = arith.constant 0 : index
    %6 = vector.load %arg5[%5, %c0_4, %c0_5] : memref<4x1x24xf32, #tpu.memory_space<vmem>>, vector<1x1x24xf32>
    %7 = vector.shape_cast %6 : vector<1x1x24xf32> to vector<1x24xf32>
    %cst = arith.constant dense<0.000000e+00> : vector<8x24xf32>
    %8 = tpu.matmul %1, %4, %cst {dimension_numbers = #tpu.dot_dimension_numbers<[1], [0], [0], [1], [0, 0, 1, 1], [], []>} : vector<8x32xf32>, vector<32x24xf32>, vector<8x24xf32> -> vector<8x24xf32>
    %9 = vector.broadcast %7 : vector<1x24xf32> to vector<8x24xf32>
    %10 = arith.addf %8, %9 : vector<8x24xf32>
    %11 = vector.extract_strided_slice %10 {offsets = [0, 0], sizes = [8, 8], strides = [1, 1]} : vector<8x24xf32> to vector<8x8xf32>
    %cst_6 = arith.constant 0.353553385 : f32
    %12 = vector.broadcast %cst_6 : f32 to vector<8x8xf32>
    %13 = arith.mulf %11, %12 : vector<8x8xf32>
    %c0_7 = arith.constant 0 : index
    %c0_8 = arith.constant 0 : index
    %c0_9 = arith.constant 0 : index
    %c0_10 = arith.constant 0 : index
    %14 = vector.load %arg6[%c0_7, %c0_8, %c0_9, %c0_10] : memref<1x1x8x8xf32, #tpu.memory_space<vmem>>, vector<1x1x8x8xf32>
    %15 = vector.shape_cast %14 : vector<1x1x8x8xf32> to vector<8x8xf32>
    %16 = vector.shape_cast %13 : vector<8x8xf32> to vector<1x1x8x8xf32>
    tpu.vector_store %arg6[%c0_7, %c0_8, %c0_9, %c0_10], %16 {strides = array<i32>} : memref<1x1x8x8xf32, #tpu.memory_space<vmem>>, vector<1x1x8x8xf32>,
    %17 = vector.extract_strided_slice %10 {offsets = [0, 8], sizes = [8, 8], strides = [1, 1]} : vector<8x24xf32> to vector<8x8xf32>
    %c0_11 = arith.constant 0 : index
    %c0_12 = arith.constant 0 : index
    %c0_13 = arith.constant 0 : index
    %c0_14 = arith.constant 0 : index
    %18 = vector.load %arg7[%c0_11, %c0_12, %c0_13, %c0_14] : memref<1x1x8x8xf32, #tpu.memory_space<vmem>>, vector<1x1x8x8xf32>
    %19 = vector.shape_cast %18 : vector<1x1x8x8xf32> to vector<8x8xf32>
    %20 = vector.shape_cast %17 : vector<8x8xf32> to vector<1x1x8x8xf32>
    tpu.vector_store %arg7[%c0_11, %c0_12, %c0_13, %c0_14], %20 {strides = array<i32>} : memref<1x1x8x8xf32, #tpu.memory_space<vmem>>, vector<1x1x8x8xf32>,
    %21 = vector.extract_strided_slice %10 {offsets = [0, 16], sizes = [8, 8], strides = [1, 1]} : vector<8x24xf32> to vector<8x8xf32>
    %c0_15 = arith.constant 0 : index
    %c0_16 = arith.constant 0 : index
    %c0_17 = arith.constant 0 : index
    %c0_18 = arith.constant 0 : index
    %22 = vector.load %arg8[%c0_15, %c0_16, %c0_17, %c0_18] : memref<1x1x8x8xf32, #tpu.memory_space<vmem>>, vector<1x1x8x8xf32>
    %23 = vector.shape_cast %22 : vector<1x1x8x8xf32> to vector<8x8xf32>
    %24 = vector.shape_cast %21 : vector<8x8xf32> to vector<1x1x8x8xf32>
    tpu.vector_store %arg8[%c0_15, %c0_16, %c0_17, %c0_18], %24 {strides = array<i32>} : memref<1x1x8x8xf32, #tpu.memory_space<vmem>>, vector<1x1x8x8xf32>,
    return
  }
  func.func @transform_0(%arg0: i32, %arg1: i32, %arg2: i32) -> (i32, i32, i32) {
    %c0_i32 = arith.constant 0 : i32
    %c0_i32_0 = arith.constant 0 : i32
    return %arg0, %arg1, %c0_i32 : i32, i32, i32
  }
  func.func @transform_1(%arg0: i32, %arg1: i32, %arg2: i32) -> (i32, i32, i32) {
    %c0_i32 = arith.constant 0 : i32
    %c0_i32_0 = arith.constant 0 : i32
    %c0_i32_1 = arith.constant 0 : i32
    %c0_i32_2 = arith.constant 0 : i32
    return %c0_i32, %c0_i32_0, %c0_i32_1 : i32, i32, i32
  }
  func.func @transform_2(%arg0: i32, %arg1: i32, %arg2: i32) -> (i32, i32, i32) {
    %c0_i32 = arith.constant 0 : i32
    %c0_i32_0 = arith.constant 0 : i32
    %c0_i32_1 = arith.constant 0 : i32
    %c0_i32_2 = arith.constant 0 : i32
    return %c0_i32, %c0_i32_0, %c0_i32_1 : i32, i32, i32
  }
  func.func @transform_3(%arg0: i32, %arg1: i32, %arg2: i32) -> (i32, i32, i32, i32) {
    %c0_i32 = arith.constant 0 : i32
    %c0_i32_0 = arith.constant 0 : i32
    return %arg0, %arg2, %arg1, %c0_i32 : i32, i32, i32, i32
  }
  func.func @transform_4(%arg0: i32, %arg1: i32, %arg2: i32) -> (i32, i32, i32, i32) {
    %c0_i32 = arith.constant 0 : i32
    %c0_i32_0 = arith.constant 0 : i32
    return %arg0, %arg2, %arg1, %c0_i32 : i32, i32, i32, i32
  }
  func.func @transform_5(%arg0: i32, %arg1: i32, %arg2: i32) -> (i32, i32, i32, i32) {
    %c0_i32 = arith.constant 0 : i32
    %c0_i32_0 = arith.constant 0 : i32
    return %arg0, %arg2, %arg1, %c0_i32 : i32, i32, i32, i32
  }
}

</mosaic_0001>

<bundles_post_ra>
// kernel: tpu_custom_call.1
= control target key start
LH: loop header
LB: loop body
LE: loop exit
PB: predicated region body
PF: predicated region fallthrough
CT: control target
= control target key end

     0   :  { %s1104_s0 = inlined_call_operand.vmem [shape: f32[2,8,32], index: 0, kind: input, shape index: {}]   ;;  %s1105_s1 = inlined_call_operand.vmem [shape: f32[4,32,24], index: 1, kind: input, shape index: {}]   ;;  %s1106_s2 = inlined_call_operand.vmem [shape: f32[4,1,24], index: 2, kind: input, shape index: {}]   ;;  %s1107_s3 = inlined_call_operand.hbm [shape: f32[2,4,8,8], index: 3, kind: output, shape index: {0}]   ;;  %s1108_s4 = inlined_call_operand.hbm [shape: f32[2,4,8,8], index: 4, kind: output, shape index: {1}]   ;;  %s1109_s5 = inlined_call_operand.hbm [shape: f32[2,4,8,8], index: 5, kind: output, shape index: {2}]  }
   0x1   :  { %1113 = sst [smem:[#allocation9_spill]] %s1104_s0 }
   0x2   :  { %11 = vsyncpa [#allocation3], 0 }
   0x3   :  { %13 = vsyncpa [#allocation3 + $0x1], 0 }
   0x4   :  { %14 = vsyncpa [#allocation5], 0 }
   0x5   :  { %16 = vsyncpa [#allocation5 + $0x1], 0  ;;  %s900_s18 = smov 0   ;;  %s902_s19 = smov 0  }
   0x6   :  { %s904_s20 = smov 0   ;;  %s906_s21 = smov 0  }
   0x7   :  { %s908_s22 = smov 0   ;;  %s910_s23 = smov 0  }
   0x8   :  { %s912_s24 = smov 0   ;;  %s914_s25 = smov 0  }
   0x9 LB: > { %s1111_s26 = sadd.s32 4294967295, %s861_s25   ;;  %s1110_s27 = sadd.s32 4294967294, %s861_s25   ;;  %s861_s25 = sphi %s914_s25, %s22_s25   ;;  %s857_s24 = sphi %s912_s24, %s1128_s24   ;;  %s853_s23 = sphi %s910_s23, %s1127_s23   ;;  %s849_s22 = sphi %s908_s22, %s1126_s22   ;;  %s845_s21 = sphi %s906_s21, %s1125_s21   ;;  %s841_s20 = sphi %s904_s20, %s1124_s20   ;;  %s837_s19 = sphi %s902_s19, %s1123_s19   ;;  %s833_s18 = sphi %s900_s18, %s1122_s18  }
   0xa   : > { %s34_s28 = sadd.s32 1, %s853_s23  ;;  %s41_s29 = sadd.s32 1, %s857_s24 }
   0xb   : > { %p35_p0 = scmp.ge.s32.totalorder %s34_s28, 4  ;;  %p132_p1 = scmp.ne.s32.totalorder %s841_s20, %s837_s19 }
   0xc   : > { %p133_p2 = scmp.eq.s32.totalorder %s1111_s26, 7  ;;  %p138_p5 = scmp.ne.s32.totalorder %s837_s19, %s833_s18 }
   0xd   : > { %s1130_s28 = smov (%p35_p0, %s34_s28), 0  ;;  %s1132_s29 = smov (!%p35_p0, %s41_s29), %s857_s24 }
   0xe   : > { %s116_s30 = ssub.s32 %s853_s23, %s1130_s28  ;;  %p953_p3 = por %p133_p2, %p132_p1 }
   0xf   : > { %p43_p4 = scmp.ge.s32.totalorder %s1132_s29, 2  ;;  %p139_p6 = scmp.eq.s32.totalorder %s1110_s27, 7 }
  0x10   : > { %p593_p7 = scmp.ge.s32.totalorder %s861_s25, 1  ;;  %p233_p9 = scmp.lt.s32.totalorder %s861_s25, 9 }
  0x11   : > { %s1134_s29 = smov (%p43_p4, %s1132_s29), 0  ;;  %p964_p8 = por %p139_p6, %p138_p5 }
  0x12   : > { %s115_s8 = ssub.s32 %s857_s24, %s1134_s29  ;;  %s122_s9 = sadd.s32 1, %s841_s20 }
  0x13   : > { %s117_s10 = sor.u32 %s116_s30, %s115_s8  ;;  %p234_p10 = pnand %p593_p7, %p233_p9 }
  0x14   : > { %p120_p11 = scmp.eq.s32.totalorder %s117_s10, 0  ;;  %s598_s12 = sshll.u32 (!%p234_p10), %s845_s21, 5 }
  0x15   : > { %237 = sbr.rel (%p234_p10) target bundleno = 382 (0x17e), region = 32  ;;  %p273_p12 = scmp.lt.s32.totalorder (!%p234_p10), %s849_s22, 1 }
  0x16   : > { %s973_s11 = scalar_select %p120_p11, %s841_s20, %s122_s9  }
  0x17   : > { %s282_s15 = scalar_lea.vmem (!%p234_p10), %s1105_s1, %s598_s12  ;;  %s1116_s0 = sld [smem:[#allocation9_spill]] (!%p234_p10) }
  0x18   : > { %s256_s10 = sand.u32 (!%p234_p10), 1, %s837_s19   ;;  %s604_s12 = sshll.u32 (!%p234_p10), %s849_s22, 2 }
  0x19   : > { %s287_s27 = scalar_lea.vmem (!%p234_p10), %s1106_s2, %s845_s21  ;;  %s404_s26 = sadd.s32 (!%p234_p10), %s845_s21, %s604_s12 }
  0x1a   : > { %v863_v0 = vmov 0.0   ;;  %vm864_vm0 = vmmov 0   ;;  %v286_v1 = vld [vmem:[%s282_s15 + $0x18] sm:$0xff]  ;;  %v285_v2 = vld [vmem:[%s282_s15 + $0x10] sm:$0xff]  ;;  %s274_s16 = scalar_select %p273_p12, %s849_s22, 1  ;;  %v284_v3 = vld [vmem:[%s282_s15 + $0x8] sm:$0xff] }
  0x1b   : > { %617 = vmatprep.subr.mxu0 %v863_v0  ;;  %625 = vmatprep.mubr.msk.f32.mxu0 %vm864_vm0, %v863_v0  ;;  %v283_v4 = vld [vmem:[%s282_s15] sm:$0xff]  ;;  %vm295_vm1 = vcmask 261120   ;;  %s993_s15 = sshll.u32 %s404_s26, 7  ;;  %vm370_vm2 = vcmask 64512   ;;  %s865_s22 = smov 120  }
  0x1c   : > { %618 = vmatpush3.msra.mxu0 %v286_v1  ;;  %s597_s17 = sshll.u32 %s274_s16, 3  ;;  %s990_s16 = sshll.u32 %s256_s10, 3  ;;  %v599_v6 = vld [vmem:[%s287_s27] ss:$0 sm:$0xff] }
  0x1d   : > { %619 = vmatprep.subr.mxu0 %v863_v0  ;;  %s279_s9 = scalar_lea.vmem %s1116_s0, %s597_s17  ;;  %s258_s17 = scalar_lea.vmem [#allocation2], %s990_s16 }
  0x1e   : > { %620 = vmatpush3.msra.mxu0 %v285_v2  ;;  %v280_v5 = vld [vmem:[%s279_s9] sm:$0xff]  ;;  %s408_s30 = sshll.u32 %s258_s17, 4  ;;  %s406_s13 = scalar_lea.hbm %s1107_s3, %s993_s15  ;;  %s409_s30 = int_to_ptr.vmem [resolvable:$true] %s408_s30 }
  0x1f   : > { %621 = vmatprep.subr.mxu0 %v863_v0  ;;  %s382_s21 = scalar_lea.sflag [#allocation3], %s256_s10  ;;  %s713_s27 = scalar_lea.vmem %s409_s30, 128 }
  0x20   : > { %622 = vmatpush3.msra.mxu0 %v284_v3  ;;  %p714_p13 = scmp.ne.s32.totalorder %s409_s30, %s713_s27  ;;  %s866_s26 = smov [#allocation2]  }
  0x21   : > { %623 = vmatprep.subr.mxu0 %v863_v0  ;;  %s717_s12 = sshll.u32 %s866_s26, 4  ;;  %s718_s12 = int_to_ptr.vmem [resolvable:$false] %s717_s12 }
  0x22   : > { %624 = vmatpush3.msra.mxu0 %v283_v4  ;;  %p715_p0 = pnand %p714_p13, %p953_p3  ;;  %s719_s14 = scalar_lea.vmem %s718_s12, 256 }
  0x23   : > { %626 = vmatmul.mubr.msk.f32.vlgmr.msra.gmra.mxu0 %vm295_vm1, %v280_v5  ;;  %p720_p2 = scmp.lt.s32.totalorder %s409_s30, %s718_s12  ;;  %p721_p4 = scmp.lt.s32.totalorder %s719_s14, %s713_s27 }
  0x24   : > { %p716_p1 = pneg %p715_p0 }
  0x25   : > { %p722_p5 = por %p721_p4, %p720_p2 }
  0x27   : > { %p723_p6 = pnand %p722_p5, %p716_p1 }
  0xe3   : > { %v365_v7 = vpop.f32.mrf.mxu0 }
  0xe4   : > { %v366_v8 = vadd.f32 %v599_v6, %v365_v7 }
  0xe5   : > { %v627_v9 = vpop.f32.mrf.mxu0 }
  0xe6   : > { %v369_v10 = vmul.f32 0.35355338, %v366_v8  ;;  %373 = vrot.lane.b32.xlu0 %v366_v8, %s865_s22 }
  0xe8   : > { %371 = vst.msk [vmem:[%s258_s17] sm:$0xff] %vm370_vm2, %v369_v10 }
  0xe9   : > { %726 = shalt.err (!%p723_p6)
}
  0xea   : > { %s727_s22 = scalar_lea.hbm %s406_s13, 128  ;;  %s731_s8 = scalar_lea.hbm %s1107_s3, 1024 }
  0xeb   : > { %p728_p7 = scmp.ne.s32.totalorder %s406_s13, %s727_s22  ;;  %p732_p11 = scmp.lt.s32.totalorder %s406_s13, %s1107_s3 }
  0xec   : > { %p733_p12 = scmp.lt.s32.totalorder %s731_s8, %s727_s22 }
  0xed   : > { %p729_p9 = pnand %p728_p7, %p953_p3 }
  0xee   : > { %p734_p13 = por %p733_p12, %p732_p11 }
  0xef   : > { %p730_p10 = pneg %p729_p9 }
  0xf1   : > { %p735_p0 = pnand %p734_p13, %p730_p10 }
  0xf3   : > { %738 = shalt.err (!%p735_p0)
}
  0xf4   : > { %628 = dma.vmem_to_hbm [thread:$0]  (%p953_p3), %s409_s30, 128, %s406_s13, %s382_s21  }
  0xf5   : > { %s867_s27 = smov 112   ;;  %s1117_s26 = sadd.s32 4294967295, %s861_s25  }
  0xf6   : > { %377 = vrot.lane.b32.xlu0 %v366_v8, %s867_s27  ;;  %s1015_s12 = sand.u32 1, %s1117_s26   ;;  %s265_s0 = scalar_lea.vmem [#allocation4], %s990_s16 }
  0xf7   : > { %s424_s14 = sshll.u32 %s265_s0, 4  ;;  %s1022_s17 = scalar_lea.hbm %s1108_s4, %s993_s15  ;;  %s1024_s14 = int_to_ptr.vmem [resolvable:$true] %s424_s14 }
  0xf8   : > { %s1112_s30 = scalar_lea.vmem [#allocation6], %s990_s16  ;;  %s739_s8 = scalar_lea.vmem %s1024_s14, 128 }
  0xf9   : > { %s440_s13 = sshll.u32 %s1112_s30, 4  ;;  %p740_p1 = scmp.ne.s32.totalorder %s1024_s14, %s739_s8  ;;  %s441_s13 = int_to_ptr.vmem [resolvable:$true] %s440_s13 }
  0xfa   : > { %s868_s9 = smov [#allocation4]  }
  0xfb   : > { %p741_p2 = pnand %p740_p1, %p953_p3  ;;  %s743_s27 = sshll.u32 %s868_s9, 4  ;;  %s744_s27 = int_to_ptr.vmem [resolvable:$false] %s743_s27 }
  0xfc   : > { %s745_s26 = scalar_lea.vmem %s744_s27, 256  ;;  %p746_p5 = scmp.lt.s32.totalorder %s1024_s14, %s744_s27 }
  0xfd   : > { %p742_p4 = pneg %p741_p2  ;;  %p747_p6 = scmp.lt.s32.totalorder %s745_s26, %s739_s8 }
  0xff   : > { %p748_p7 = por %p747_p6, %p746_p5 }
 0x101   : > { %p749_p9 = pnand %p748_p7, %p742_p4 }
 0x158   : > { %v374_v11 = vpop.permute.xlu0 %373 }
 0x159   : > { %376 = vst.msk [vmem:[%s265_s0] sm:$0xff] %vm370_vm2, %v374_v11 }
 0x15a   : > { %752 = shalt.err (!%p749_p9)
}
 0x15b   : > { %s753_s0 = scalar_lea.hbm %s1022_s17, 128  ;;  %s757_s9 = scalar_lea.hbm %s1108_s4, 1024 }
 0x15c   : > { %p754_p10 = scmp.ne.s32.totalorder %s1022_s17, %s753_s0  ;;  %p758_p13 = scmp.lt.s32.totalorder %s1022_s17, %s1108_s4 }
 0x15d   : > { %p759_p0 = scmp.lt.s32.totalorder %s757_s9, %s753_s0 }
 0x15e   : > { %p755_p11 = pnand %p754_p10, %p953_p3 }
 0x15f   : > { %p760_p1 = por %p759_p0, %p758_p13 }
 0x160   : > { %p756_p12 = pneg %p755_p11 }
 0x162   : > { %p761_p2 = pnand %p760_p1, %p756_p12 }
 0x164   : > { %764 = shalt.err (!%p761_p2)
}
 0x165   : > { %s1118_s8 = scalar_lea.sflag [#allocation5], %s1015_s12  ;;  %s438_s30 = scalar_lea.hbm %s1109_s5, %s993_s15 }
 0x166   : > { %629 = dma.vmem_to_hbm [thread:$0]  (%p953_p3), %s1024_s14, 128, %s1022_s17, %s1118_s8  }
 0x167   : > { %s1119_s21 = scalar_lea.vmem [#allocation6], %s990_s16  ;;  %s765_s0 = scalar_lea.vmem %s441_s13, 128 }
 0x168   : > { %v378_v12 = vpop.permute.xlu0 %377  ;;  %p766_p4 = scmp.ne.s32.totalorder %s441_s13, %s765_s0  ;;  %s869_s22 = smov [#allocation6]  }
 0x169   : > { %380 = vst.msk [vmem:[%s1119_s21] sm:$0xff] %vm370_vm2, %v378_v12  ;;  %s769_s10 = sshll.u32 %s869_s22, 4  ;;  %s770_s10 = int_to_ptr.vmem [resolvable:$false] %s769_s10 }
 0x16a   : > { %p767_p5 = pnand %p766_p4, %p953_p3  ;;  %s771_s9 = scalar_lea.vmem %s770_s10, 256 }
 0x16b   : > { %p772_p7 = scmp.lt.s32.totalorder %s441_s13, %s770_s10  ;;  %p773_p9 = scmp.lt.s32.totalorder %s771_s9, %s765_s0 }
 0x16c   : > { %p768_p6 = pneg %p767_p5 }
 0x16d   : > { %p774_p10 = por %p773_p9, %p772_p7 }
 0x16f   : > { %p775_p11 = pnand %p774_p10, %p768_p6 }
 0x171   : > { %778 = shalt.err (!%p775_p11)
}
 0x172   : > { %s779_s14 = scalar_lea.hbm %s438_s30, 128  ;;  %s783_s17 = scalar_lea.hbm %s1109_s5, 1024 }
 0x173   : > { %p780_p12 = scmp.ne.s32.totalorder %s438_s30, %s779_s14  ;;  %p784_p1 = scmp.lt.s32.totalorder %s438_s30, %s1109_s5 }
 0x174   : > { %p785_p2 = scmp.lt.s32.totalorder %s783_s17, %s779_s14 }
 0x175   : > { %p781_p13 = pnand %p780_p12, %p953_p3 }
 0x176   : > { %p786_p4 = por %p785_p2, %p784_p1 }
 0x177   : > { %p782_p0 = pneg %p781_p13 }
 0x179   : > { %p787_p5 = pnand %p786_p4, %p782_p0 }
 0x17b   : > { %790 = shalt.err (!%p787_p5)
}
 0x17c   : > { %s1120_s26 = scalar_lea.sflag [#allocation5], %s1015_s12 }
 0x17d   : > { %630 = dma.vmem_to_hbm [thread:$0]  (%p953_p3), %s441_s13, 128, %s438_s30, %s1120_s26  }
 0x17e PF: > { %p644_p6 = scmp.ge.s32.totalorder %s861_s25, 2  ;;  %s452_s21 = sand.u32 1, %s833_s18  }
 0x17f   : > { %s453_s0 = scalar_lea.sflag [#allocation3], %s452_s21 }
 0x180   : > { %p635_p7 = pnand %p644_p6, %p964_p8 }
 0x182   : > { %p636_p9 = pneg %p635_p7 }
 0x184   : > { %824 = dma.done.wait (%p636_p9), %s453_s0, 128  }
 0x185   : > { %826 = vsyncadd (%p636_p9), %s453_s0, 4294967168  ;;  %s1121_s22 = sadd.s32 4294967294, %s861_s25  }
 0x186   : > { %s461_s10 = sand.u32 1, %s1121_s22  }
 0x187   : > { %s462_s9 = scalar_lea.sflag [#allocation5], %s461_s10 }
 0x188   : > { %828 = dma.done.wait (%p636_p9), %s462_s9, 256  }
 0x189   : > { %830 = vsyncadd (%p636_p9), %s462_s9, 4294967040  ;;  %s22_s25 = sadd.s32 1, %s861_s25   ;;  %s1122_s18 = smov %s837_s19 }
 0x18a   : > { %p19_p3 = scmp.ge.s32.totalorder %s22_s25, 10   ;;  %s1123_s19 = smov %s841_s20 }
 0x18b   : > { %s1124_s20 = smov %s973_s11  ;;  %s1125_s21 = smov %s853_s23 }
 0x18c   : > { %s1126_s22 = smov %s857_s24  ;;  %s1127_s23 = smov %s1130_s28 }
 0x18d   : > { %s1128_s24 = smov %s1134_s29  ;;  %21 = sbr.rel (!%p19_p3) target bundleno = 9 (0x9), region = 101 }
 0x192   :  { %476 = vsyncpa [#allocation3], 1 }
 0x193   :  { %478 = vsyncpa [#allocation3 + $0x1], 1 }
 0x194   :  { %479 = vsyncpa [#allocation5], 1 }
 0x195   :  { %481 = vsyncpa [#allocation5 + $0x1], 1 }

</bundles_post_ra>
